<compile_context>
chip_gen: v7x
topology: tpu7x:2x2x1
jax: 0.10.0
libtpu: 0.0.40
codegen_flags: <defaults>
</compile_context>

<pallas_src>
import math

import jax
import jax.numpy as jnp
from jax.experimental import pallas as pl
from jax.experimental.pallas import tpu as pltpu


def _choose_tile(n, cap=256):
    """Largest sequence tile <= cap: full extent if it fits, otherwise the
    largest multiple-of-8 divisor of n (sublane alignment)."""
    if n <= cap:
        return n
    for t in range(cap, 0, -8):
        if n % t == 0:
            return t
    return n


# --------------------- Kernel A: fused QKV projection -----------------------


def _qkv_proj_kernel(x_ref, w_ref, q_ref, k_ref, v_ref):
    d_out = q_ref.shape[-1]
    # One wide matmul (N = 3*d_out) instead of three narrow-N matmuls.
    qkv = jnp.dot(x_ref[0], w_ref[...], preferred_element_type=jnp.float32)
    q_ref[0] = qkv[:, :d_out].astype(q_ref.dtype)
    k_ref[0] = qkv[:, d_out:2 * d_out].astype(k_ref.dtype)
    v_ref[0] = qkv[:, 2 * d_out:].astype(v_ref.dtype)


# -------------- Kernel B: flash attention + fused output projection ---------


def _make_flash_kernel(num_heads, head_dim, scale, tile, approx_recip):
    def kernel(q_ref, k_ref, v_ref, wo_ref, bo_ref, out_ref, m_s, l_s, acc_s):
        qi = pl.program_id(1)
        ki = pl.program_id(2)
        num_kv = pl.num_programs(2)

        q_start = qi * tile
        k_start = ki * tile
        last_q = q_start + tile - 1
        last_k = k_start + tile - 1

        # ---- init running-softmax state at the first KV block -------------
        @pl.when(ki == 0)
        def _init():
            m_s[...] = jnp.full(m_s.shape, -jnp.inf, dtype=m_s.dtype)
            l_s[...] = jnp.zeros(l_s.shape, dtype=l_s.dtype)
            acc_s[...] = jnp.zeros(acc_s.shape, dtype=acc_s.dtype)

        # ---- online-softmax update (heads unrolled; static lane slices) ---
        def _update(apply_mask):
            q_all = q_ref[0]          # (tile, d_out)
            k_all = k_ref[0]          # (tile, d_out)
            v_all = v_ref[0]          # (tile, d_out)
            if apply_mask:
                # Only diagonal blocks pay for the iota mask; shared by heads.
                row = jax.lax.broadcasted_iota(jnp.int32, (tile, tile), 0)
                col = jax.lax.broadcasted_iota(jnp.int32, (tile, tile), 1)
                neg_mask = col > row + (q_start - k_start)
            for h in range(num_heads):
                sl = slice(h * head_dim, (h + 1) * head_dim)
                q_h = q_all[:, sl]
                k_h = k_all[:, sl]
                v_h = v_all[:, sl]
                s = jnp.dot(q_h, k_h.T,
                            preferred_element_type=jnp.float32) * scale
                if apply_mask:
                    s = jnp.where(neg_mask, -jnp.inf, s)
                m_prev = m_s[h]                                    # (tile, 1)
                m_new = jnp.maximum(m_prev,
                                    jnp.max(s, axis=-1, keepdims=True))
                alpha = jnp.exp(m_prev - m_new)
                p = jnp.exp(s - m_new)                          # (tile, tile)
                l_s[h] = alpha * l_s[h] + jnp.sum(p, axis=-1, keepdims=True)
                acc_s[h] = alpha * acc_s[h] + jnp.dot(
                    p.astype(v_h.dtype), v_h,
                    preferred_element_type=jnp.float32)
                m_s[h] = m_new

        # ---- causal block classification (skip / unmasked / masked) -------
        visible = k_start <= last_q           # block has >= 1 unmasked entry
        on_diagonal = jnp.logical_and(visible, last_k > q_start)
        below_diagonal = jnp.logical_and(visible, last_k <= q_start)

        @pl.when(below_diagonal)              # fully visible: no mask needed
        def _():
            _update(apply_mask=False)

        @pl.when(on_diagonal)                 # straddles the causal boundary
        def _():
            _update(apply_mask=True)

        # ---- finalize: normalize, concat heads, single out-proj matmul ----
        @pl.when(ki == num_kv - 1)
        def _finalize():
            parts = []
            for h in range(num_heads):
                if approx_recip:
                    inv_l = pl.reciprocal(l_s[h], approx=True)
                else:
                    inv_l = 1.0 / l_s[h]
                parts.append(acc_s[h] * inv_l)
            ctx = jnp.concatenate(parts, axis=-1)         # (tile, d_out) f32
            out = jnp.dot(ctx.astype(wo_ref.dtype), wo_ref[...],
                          preferred_element_type=jnp.float32) + bo_ref[...]
            out_ref[0] = out.astype(out_ref.dtype)

    return kernel


# ------------------------------- wrapper -------------------------------------


def multi_head_attention(x, w_q, w_k, w_v, w_o, b_o, num_heads, *,
                         compute_dtype=jnp.float32):
    """x: (b, T, d_in); w_q/w_k/w_v: (d_in, d_out); w_o: (d_out, d_out);
    b_o: (d_out,).  Weights are (in, out)-oriented; qkv_bias=False."""
    b, T, d_in = x.shape
    d_out = w_q.shape[1]
    assert d_out % num_heads == 0, "d_out must be divisible by num_heads"
    head_dim = d_out // num_heads

    cd = compute_dtype
    x_c = x.astype(cd)
    wqkv = jnp.concatenate([w_q, w_k, w_v], axis=1).astype(cd)  # (d_in, 3*dout)
    wo_c = w_o.astype(cd)
    bo = b_o.reshape(1, d_out).astype(jnp.float32)

    vmem_params = dict(vmem_limit_bytes=48 * 1024 * 1024)

    # ---------- Kernel A: fused QKV projection ----------
    t_proj = _choose_tile(T)
    assert T % t_proj == 0, "sequence length must be divisible by the tile"
    q, k, v = pl.pallas_call(
        _qkv_proj_kernel,
        out_shape=tuple(
            jax.ShapeDtypeStruct((b, T, d_out), cd) for _ in range(3)),
        grid_spec=pltpu.PrefetchScalarGridSpec(
            num_scalar_prefetch=0,
            grid=(b, T // t_proj),
            in_specs=[
                pl.BlockSpec((1, t_proj, d_in), lambda bi, ti: (bi, ti, 0)),
                pl.BlockSpec((d_in, 3 * d_out), lambda bi, ti: (0, 0)),
            ],
            out_specs=[
                pl.BlockSpec((1, t_proj, d_out), lambda bi, ti: (bi, ti, 0))
                for _ in range(3)
            ],
        ),
        compiler_params=pltpu.CompilerParams(
            dimension_semantics=("parallel", "parallel"), **vmem_params),
    )(x_c, wqkv)

    # ---------- Kernel B: flash attention + fused output projection ----------
    tile = _choose_tile(T)
    assert T % tile == 0
    num_t = T // tile
    scale = 1.0 / math.sqrt(head_dim)
    approx_recip = jnp.dtype(cd) != jnp.dtype(jnp.float32)
    kernel = _make_flash_kernel(num_heads, head_dim, scale, tile, approx_recip)

    return pl.pallas_call(
        kernel,
        out_shape=jax.ShapeDtypeStruct((b, T, d_out), jnp.float32),
        grid_spec=pltpu.PrefetchScalarGridSpec(
            num_scalar_prefetch=0,
            grid=(b, num_t, num_t),
            in_specs=[
                pl.BlockSpec((1, tile, d_out), lambda bi, qi, ki: (bi, qi, 0)),
                pl.BlockSpec((1, tile, d_out), lambda bi, qi, ki: (bi, ki, 0)),
                pl.BlockSpec((1, tile, d_out), lambda bi, qi, ki: (bi, ki, 0)),
                pl.BlockSpec((d_out, d_out), lambda bi, qi, ki: (0, 0)),
                pl.BlockSpec((1, d_out), lambda bi, qi, ki: (0, 0)),
            ],
            out_specs=pl.BlockSpec((1, tile, d_out),
                                   lambda bi, qi, ki: (bi, qi, 0)),
            scratch_shapes=[
                pltpu.VMEM((num_heads, tile, 1), jnp.float32),         # m
                pltpu.VMEM((num_heads, tile, 1), jnp.float32),         # l
                pltpu.VMEM((num_heads, tile, head_dim), jnp.float32),  # acc
            ],
        ),
        compiler_params=pltpu.CompilerParams(
            dimension_semantics=("parallel", "parallel", "arbitrary"),
            **vmem_params),
    )(q, k, v, wo_c, bo)


# ------------------------------- reference ----------------------------------


def _reference(x, w_q, w_k, w_v, w_o, b_o, num_heads):
    """Pure-JAX reference mirroring the PyTorch forward (dropout = identity)."""
    b, T, d_in = x.shape
    d_out = w_q.shape[1]
    head_dim = d_out // num_heads

    q = (x @ w_q).reshape(b, T, num_heads, head_dim).transpose(0, 2, 1, 3)
    k = (x @ w_k).reshape(b, T, num_heads, head_dim).transpose(0, 2, 1, 3)
    v = (x @ w_v).reshape(b, T, num_heads, head_dim).transpose(0, 2, 1, 3)

    scores = jnp.einsum("bhqd,bhkd->bhqk", q, k)
    mask = jnp.triu(jnp.ones((T, T), dtype=bool), k=1)
    scores = jnp.where(mask[None, None], -jnp.inf, scores)
    attn = jax.nn.softmax(scores / math.sqrt(head_dim), axis=-1)

    ctx = jnp.einsum("bhqk,bhkd->bhqd", attn, v)
    ctx = ctx.transpose(0, 2, 1, 3).reshape(b, T, d_out)
    return ctx @ w_o + b_o


if __name__ == "__main__":
    # Small, deterministic configuration consistent with the module.
    batch, seq, d_in, d_out, num_heads = 2, 8, 32, 32, 4

    key = jax.random.PRNGKey(0)
    kx, kq, kk, kv, ko, kb = jax.random.split(key, 6)

    x = jax.random.normal(kx, (batch, seq, d_in), dtype=jnp.float32)

    # Deterministic synthetic parameters (stored as (in, out); qkv_bias=False).
    scale_in = 1.0 / math.sqrt(d_in)
    scale_out = 1.0 / math.sqrt(d_out)
    w_q = jax.random.uniform(kq, (d_in, d_out), jnp.float32, -scale_in, scale_in)
    w_k = jax.random.uniform(kk, (d_in, d_out), jnp.float32, -scale_in, scale_in)
    w_v = jax.random.uniform(kv, (d_in, d_out), jnp.float32, -scale_in, scale_in)
    w_o = jax.random.uniform(ko, (d_out, d_out), jnp.float32, -scale_out, scale_out)
    b_o = jax.random.uniform(kb, (d_out,), jnp.float32, -scale_out, scale_out)

    ref = _reference(x, w_q, w_k, w_v, w_o, b_o, num_heads)

    # Full-precision path (exact reciprocal) -- tight numerical check.
    out_f32 = multi_head_attention(x, w_q, w_k, w_v, w_o, b_o, num_heads,
                                   compute_dtype=jnp.float32)
    out_f32 = jax.block_until_ready(out_f32)
    assert out_f32.shape == (batch, seq, d_out)
    assert jnp.allclose(out_f32, ref, atol=1e-4, rtol=1e-4), \
        "f32 mismatch vs JAX reference"

    # bf16 MXU fast path (f32 accumulation / f32 softmax) -- relaxed check.
    out_bf16 = multi_head_attention(x, w_q, w_k, w_v, w_o, b_o, num_heads,
                                    compute_dtype=jnp.bfloat16)
    out_bf16 = jax.block_until_ready(out_bf16)
    assert out_bf16.shape == (batch, seq, d_out)
    assert out_bf16.dtype == jnp.float32
    assert bool(jnp.all(jnp.isfinite(out_bf16)))
    assert jnp.allclose(out_bf16, ref, atol=5e-2, rtol=5e-2), \
        "bf16 mismatch vs JAX reference"

    print("KERNEL_OK")
</pallas_src>

<mosaic_0001>
module attributes {stable_mosaic.version = 11 : i64} {
  func.func @_qkv_proj_kernel(%arg0: i32, %arg1: i32, %arg2: memref<1x8x32xf32, #tpu.memory_space<vmem>>, %arg3: memref<32x96xf32, #tpu.memory_space<vmem>>, %arg4: memref<1x8x32xf32, #tpu.memory_space<vmem>>, %arg5: memref<1x8x32xf32, #tpu.memory_space<vmem>>, %arg6: memref<1x8x32xf32, #tpu.memory_space<vmem>>) attributes {dimension_semantics = [#tpu.dimension_semantics<parallel>, #tpu.dimension_semantics<parallel>], iteration_bounds = array<i64: 2, 1>, scalar_prefetch = 0 : i64, scratch_operands = 0 : i64, tpu.core_type = #tpu.core_type<tc>, window_params = [{transform_indices = @transform_0, window_bounds = array<i64: 1, 8, 32>}, {pipeline_mode = #tpu.pipeline_mode<synchronous>, transform_indices = @transform_1, window_bounds = array<i64: 32, 96>}, {transform_indices = @transform_2, window_bounds = array<i64: 1, 8, 32>}, {transform_indices = @transform_3, window_bounds = array<i64: 1, 8, 32>}, {transform_indices = @transform_4, window_bounds = array<i64: 1, 8, 32>}]} {
    %c0 = arith.constant 0 : index
    %c0_0 = arith.constant 0 : index
    %c0_1 = arith.constant 0 : index
    %0 = vector.load %arg2[%c0, %c0_0, %c0_1] : memref<1x8x32xf32, #tpu.memory_space<vmem>>, vector<1x8x32xf32>
    %1 = vector.shape_cast %0 : vector<1x8x32xf32> to vector<8x32xf32>
    %c0_2 = arith.constant 0 : index
    %c0_3 = arith.constant 0 : index
    %2 = vector.load %arg3[%c0_2, %c0_3] : memref<32x96xf32, #tpu.memory_space<vmem>>, vector<32x96xf32>
    %cst = arith.constant dense<0.000000e+00> : vector<8x96xf32>
    %3 = tpu.matmul %1, %2, %cst {dimension_numbers = #tpu.dot_dimension_numbers<[1], [0], [0], [1], [0, 0, 1, 1], [], []>} : vector<8x32xf32>, vector<32x96xf32>, vector<8x96xf32> -> vector<8x96xf32>
    %4 = vector.extract_strided_slice %3 {offsets = [0, 0], sizes = [8, 32], strides = [1, 1]} : vector<8x96xf32> to vector<8x32xf32>
    %c0_4 = arith.constant 0 : index
    %c0_5 = arith.constant 0 : index
    %c0_6 = arith.constant 0 : index
    %5 = vector.load %arg4[%c0_4, %c0_5, %c0_6] : memref<1x8x32xf32, #tpu.memory_space<vmem>>, vector<1x8x32xf32>
    %6 = vector.shape_cast %5 : vector<1x8x32xf32> to vector<8x32xf32>
    %7 = vector.shape_cast %4 : vector<8x32xf32> to vector<1x8x32xf32>
    tpu.vector_store %arg4[%c0_4, %c0_5, %c0_6], %7 {strides = array<i32>} : memref<1x8x32xf32, #tpu.memory_space<vmem>>, vector<1x8x32xf32>,
    %8 = vector.extract_strided_slice %3 {offsets = [0, 32], sizes = [8, 32], strides = [1, 1]} : vector<8x96xf32> to vector<8x32xf32>
    %c0_7 = arith.constant 0 : index
    %c0_8 = arith.constant 0 : index
    %c0_9 = arith.constant 0 : index
    %9 = vector.load %arg5[%c0_7, %c0_8, %c0_9] : memref<1x8x32xf32, #tpu.memory_space<vmem>>, vector<1x8x32xf32>
    %10 = vector.shape_cast %9 : vector<1x8x32xf32> to vector<8x32xf32>
    %11 = vector.shape_cast %8 : vector<8x32xf32> to vector<1x8x32xf32>
    tpu.vector_store %arg5[%c0_7, %c0_8, %c0_9], %11 {strides = array<i32>} : memref<1x8x32xf32, #tpu.memory_space<vmem>>, vector<1x8x32xf32>,
    %12 = vector.extract_strided_slice %3 {offsets = [0, 64], sizes = [8, 32], strides = [1, 1]} : vector<8x96xf32> to vector<8x32xf32>
    %c0_10 = arith.constant 0 : index
    %c0_11 = arith.constant 0 : index
    %c0_12 = arith.constant 0 : index
    %13 = vector.load %arg6[%c0_10, %c0_11, %c0_12] : memref<1x8x32xf32, #tpu.memory_space<vmem>>, vector<1x8x32xf32>
    %14 = vector.shape_cast %13 : vector<1x8x32xf32> to vector<8x32xf32>
    %15 = vector.shape_cast %12 : vector<8x32xf32> to vector<1x8x32xf32>
    tpu.vector_store %arg6[%c0_10, %c0_11, %c0_12], %15 {strides = array<i32>} : memref<1x8x32xf32, #tpu.memory_space<vmem>>, vector<1x8x32xf32>,
    return
  }
  func.func @transform_0(%arg0: i32, %arg1: i32) -> (i32, i32, i32) {
    %c0_i32 = arith.constant 0 : i32
    %c0_i32_0 = arith.constant 0 : i32
    return %arg0, %arg1, %c0_i32 : i32, i32, i32
  }
  func.func @transform_1(%arg0: i32, %arg1: i32) -> (i32, i32) {
    %c0_i32 = arith.constant 0 : i32
    %c0_i32_0 = arith.constant 0 : i32
    %c0_i32_1 = arith.constant 0 : i32
    return %c0_i32, %c0_i32_0 : i32, i32
  }
  func.func @transform_2(%arg0: i32, %arg1: i32) -> (i32, i32, i32) {
    %c0_i32 = arith.constant 0 : i32
    %c0_i32_0 = arith.constant 0 : i32
    return %arg0, %arg1, %c0_i32 : i32, i32, i32
  }
  func.func @transform_3(%arg0: i32, %arg1: i32) -> (i32, i32, i32) {
    %c0_i32 = arith.constant 0 : i32
    %c0_i32_0 = arith.constant 0 : i32
    return %arg0, %arg1, %c0_i32 : i32, i32, i32
  }
  func.func @transform_4(%arg0: i32, %arg1: i32) -> (i32, i32, i32) {
    %c0_i32 = arith.constant 0 : i32
    %c0_i32_0 = arith.constant 0 : i32
    return %arg0, %arg1, %c0_i32 : i32, i32, i32
  }
}

</mosaic_0001>

<bundles_post_ra>
// kernel: tpu_custom_call.1
= control target key start
LH: loop header
LB: loop body
LE: loop exit
PB: predicated region body
PF: predicated region fallthrough
CT: control target
= control target key end

     0   :  { %10 = vsyncpa [#allocation3], 0  ;;  %s1236_s0 = inlined_call_operand.hbm [shape: f32[2,8,32], index: 0, kind: input, shape index: {}]   ;;  %s1237_s1 = inlined_call_operand.hbm [shape: f32[32,96], index: 1, kind: input, shape index: {}]   ;;  %s1238_s2 = inlined_call_operand.hbm [shape: f32[2,8,32], index: 2, kind: output, shape index: {0}]   ;;  %s1239_s3 = inlined_call_operand.hbm [shape: f32[2,8,32], index: 3, kind: output, shape index: {1}]   ;;  %s1240_s4 = inlined_call_operand.hbm [shape: f32[2,8,32], index: 4, kind: output, shape index: {2}]  }
   0x1   :  { %12 = vsyncpa [#allocation3 + $0x1], 0 }
   0x2   :  { %13 = vsyncpa [#allocation6], 0 }
   0x3   :  { %14 = vsyncpa [#allocation4], 0 }
   0x4   :  { %16 = vsyncpa [#allocation4 + $0x1], 0 }
   0x5   :  { %17 = vsyncpa [#allocation9], 0 }
   0x6   :  { %19 = vsyncpa [#allocation9 + $0x1], 0  ;;  %s939_s15 = smov 0   ;;  %s941_s16 = smov 0  }
   0x7   :  { %s943_s17 = smov 0   ;;  %s945_s18 = smov 0  }
   0x8   :  { %s947_s19 = smov 0   ;;  %s949_s20 = smov 0  }
   0x9 LB: > { %s970_s21 = sadd.s32 4294967295, %s900_s20   ;;  %s563_s22 = sadd.s32 4294967294, %s900_s20   ;;  %s900_s20 = sphi %s949_s20, %s25_s20   ;;  %s896_s19 = sphi %s947_s19, %s1262_s19   ;;  %s892_s18 = sphi %s945_s18, %s1261_s18   ;;  %s888_s17 = sphi %s943_s17, %s1260_s17   ;;  %s884_s16 = sphi %s941_s16, %s1259_s16   ;;  %s880_s15 = sphi %s939_s15, %s1258_s15  }
   0xa   : > { %p59_p0 = scmp.ne.s32.totalorder %s884_s16, %s880_s15  ;;  %p1241_p1 = scmp.eq.s32.totalorder %s970_s21, 0 }
   0xb   : > { %p112_p3 = scmp.eq.s32.totalorder %s563_s22, 1  ;;  %p564_p5 = scmp.ge.s32.totalorder %s900_s20, 1 }
   0xc   : > { %p981_p4 = por %p1241_p1, %p59_p0  ;;  %p175_p7 = scmp.lt.s32.totalorder %s900_s20, 3 }
   0xd   : > { %p986_p6 = por %p112_p3, %p59_p0  ;;  %s902_s26 = smov [#allocation5]  }
   0xe   : > { %s1244_s23 = scalar_select %p981_p4, 1, 0 }
   0xf   : > { %s1245_s24 = scalar_select %p986_p6, 1, 0 }
  0x10   : > { %p991_p8 = pnand %p564_p5, %p175_p7  ;;  %s187_s27 = sshll.u32 %s902_s26, 4  ;;  %s188_s27 = int_to_ptr.vmem [resolvable:$true] %s187_s27 }
  0x11   : > { %s37_s29 = sadd.s32 1, %s896_s19  ;;  %s696_s6 = scalar_lea.hbm %s1237_s1, 512 }
  0x12   : > { %s1246_s25 = scalar_select %p991_p8, 1, 0 }
  0x13   : > { %p618_p9 = pneg %p991_p8  ;;  %p697_p12 = scmp.ne.s32.totalorder %s1237_s1, %s696_s6 }
  0x14   : > { %p703_p5 = scmp.lt.u32.totalorder %s696_s6, %s1237_s1 }
  0x15   : > { %p1000_p11 = pnand %p618_p9, %p1241_p1 }
  0x17   : > { %p698_p13 = pneg %p1000_p11 }
  0x19   : > { %p699_p0 = pnand %p698_p13, %p697_p12 }
  0x1b   : > { %p700_p3 = pneg %p699_p0 }
  0x1d   : > { %p705_p7 = pnand %p703_p5, %p700_p3 }
  0x1f   : > { %708 = shalt.err (!%p705_p7)
}
  0x20   : > { %s709_s11 = scalar_lea.vmem %s188_s27, 512  ;;  %p717_p2 = scmp.lt.s32.totalorder %s188_s27, %s188_s27 }
  0x21   : > { %p710_p9 = scmp.ne.s32.totalorder %s188_s27, %s709_s11  ;;  %p718_p6 = scmp.lt.s32.totalorder %s709_s11, %s709_s11 }
  0x23   : > { %p712_p10 = pnand %p710_p9, %p698_p13  ;;  %p719_p4 = por %p718_p6, %p717_p2 }
  0x25   : > { %p713_p1 = pneg %p712_p10 }
  0x27   : > { %p720_p8 = pnand %p719_p4, %p713_p1 }
  0x29   : > { %723 = shalt.err (!%p720_p8)
}
  0x2a   : > { %s903_s12 = smov 128   ;;  %s904_s13 = smov 8  }
  0x2b   : > { %621 = dma.hbm_to_vmem [thread:$0]  (!%p1000_p11), %s1237_s1, 512, %s188_s27, [#allocation6], %s903_s12, %s903_s12, %s904_s13  }
  0x2c   : > { %p39_p1 = scmp.ge.s32.totalorder %s37_s29, 2  ;;  %s46_s30 = sadd.s32 1, %s888_s17 }
  0x2d   : > { %p53_p2 = scmp.ne.s32.totalorder %s888_s17, %s884_s16  ;;  %p54_p4 = scmp.eq.s32.totalorder %s900_s20, 0 }
  0x2e   : > { %s1264_s29 = smov (%p39_p1, %s37_s29), 0  ;;  %p1249_p8 = scmp.eq.s32.totalorder %s970_s21, 1 }
  0x2f   : > { %p1027_p6 = por %p54_p4, %p53_p2  ;;  %s41_s28 = ssub.s32 %s896_s19, %s1264_s29 }
  0x30   : > { %p1033_p10 = por %p1249_p8, %p53_p2  ;;  %p637_p12 = scmp.lt.s32.totalorder %s900_s20, 2 }
  0x31   : > { %p44_p11 = scmp.eq.s32.totalorder %s41_s28, 0  ;;  %s201_s27 = sand.u32 1, %s888_s17  }
  0x32   : > { %s567_s7 = sshll.u32 %s201_s27, 3  ;;  %s568_s9 = sshll.u32 %s896_s19, 7 }
  0x33   : > { %s1042_s8 = scalar_select %p44_p11, %s888_s17, %s46_s30  }
  0x34   : > { %s1048_s12 = scalar_lea.hbm %s1236_s0, %s568_s9  ;;  %s205_s13 = scalar_lea.vmem [#allocation2], %s567_s7 }
  0x35   : > { %s213_s14 = sshll.u32 %s205_s13, 4  ;;  %p1054_p13 = pnand %p637_p12, %p1027_p6  ;;  %s1050_s14 = int_to_ptr.vmem [resolvable:$true] %s213_s14 }
  0x36   : > { %s202_s30 = scalar_lea.sflag [#allocation3], %s201_s27  ;;  %s724_s28 = scalar_lea.hbm %s1048_s12, 128 }
  0x37   : > { %p725_p0 = scmp.ne.s32.totalorder %s1048_s12, %s724_s28  ;;  %p726_p3 = pneg %p1054_p13 }
  0x38   : > { %s729_s10 = scalar_lea.hbm %s1236_s0, 256  ;;  %p730_p9 = scmp.lt.u32.totalorder %s1048_s12, %s1236_s0 }
  0x39   : > { %p727_p5 = pnand %p726_p3, %p725_p0  ;;  %p731_p1 = scmp.lt.u32.totalorder %s729_s10, %s724_s28 }
  0x3a   : > { %p733_p4 = scmp.lt.u32.totalorder %s724_s28, %s1048_s12 }
  0x3b   : > { %p728_p7 = pneg %p727_p5  ;;  %p732_p2 = por %p731_p1, %p730_p9 }
  0x3d   : > { %p734_p6 = por %p733_p4, %p732_p2 }
  0x3f   : > { %p735_p8 = pnand %p734_p6, %p728_p7 }
  0x41   : > { %738 = shalt.err (!%p735_p8)
}
  0x42   : > { %s739_s27 = scalar_lea.vmem %s1050_s14, 128  ;;  %s905_s13 = smov [#allocation2]  }
  0x43   : > { %p740_p12 = scmp.ne.s32.totalorder %s1050_s14, %s739_s27  ;;  %s744_s7 = sshll.u32 %s905_s13, 4  ;;  %s745_s7 = int_to_ptr.vmem [resolvable:$false] %s744_s7 }
  0x44   : > { %s746_s9 = scalar_lea.vmem %s745_s7, 256  ;;  %p747_p5 = scmp.lt.s32.totalorder %s1050_s14, %s745_s7 }
  0x45   : > { %p742_p11 = pnand %p740_p12, %p726_p3  ;;  %p748_p9 = scmp.lt.s32.totalorder %s746_s9, %s739_s27 }
  0x47   : > { %p743_p0 = pneg %p742_p11  ;;  %p749_p1 = por %p748_p9, %p747_p5 }
  0x49   : > { %p750_p2 = pnand %p749_p1, %p743_p0 }
  0x4b   : > { %753 = shalt.err (!%p750_p2)
}
  0x4c   : > { %625 = dma.hbm_to_vmem [thread:$0]  (!%p1054_p13), %s1048_s12, 128, %s1050_s14, %s202_s30  }
  0x4d   : > { %p1252_p7 = scmp.ne.s32.totalorder %s1246_s25, 0 }
  0x4e   : > { %s1086_s28 = sand.u32 (!%p1252_p7), 1, %s884_s16   ;;  %p1253_p3 = scmp.ne.s32.totalorder (!%p1252_p7), %s1244_s23, 0 }
  0x4f   : > { %222 = sbr.rel (%p1252_p7) target bundleno = 464 (0x1d0), region = 28  ;;  %s1089_s10 = sshll.u32 (!%p1252_p7), %s1086_s28, 3 }
  0x50   : > { %s225_s5 = scalar_lea.sflag (!%p1252_p7), [#allocation3], %s1086_s28  ;;  %s228_s11 = scalar_lea.vmem (!%p1252_p7), [#allocation2], %s1089_s10 }
  0x56   : > { %863 = dma.done.wait (%p1253_p3), %s225_s5, 128  }
  0x57   : > { %865 = vsyncadd (%p1253_p3), %s225_s5, 4294967168  ;;  %p1254_p13 = scmp.eq.s32.totalorder %s970_s21, 0 }
  0x59   : > { %867 = dma.done.wait (%p1254_p13), [#allocation6], 512   ;;  %p1255_p4 = pmov %p1254_p13 }
  0x5a   : > { %v906_v0 = vmov 0.0|0.0   ;;  %vm907_vm0 = vmmov 0   ;;  %v908_v1 = vmov 0.0   ;;  %v268_v2 = vld [vmem:[#allocation5] sm:$0xff]  ;;  %v269_v3 = vld [vmem:[#allocation5 + $0x8] sm:$0xff]  ;;  %v270_v4 = vld [vmem:[#allocation5 + $0x10] sm:$0xff] }
  0x5b   : > { %869 = vsyncadd (%p1255_p4), [#allocation6], 4294966784  ;;  %600 = vmatprep.subr.bf16.mxu0 %v906_v0  ;;  %597 = vmatprep.mubr.msk.f32.mxu0 %vm907_vm0, %v908_v1  ;;  %v601_v5 = vpack.c.bf16 %v269_v3, %v268_v2  ;;  %v271_v6 = vld [vmem:[#allocation5 + $0x18] sm:$0xff]  ;;  %vm272_vm1 = vcmask 261120   ;;  %s1103_s23 = sshll.u32 %s892_s18, 7  ;;  %s252_s25 = scalar_lea.vmem [#allocation7], %s1089_s10 }
  0x5c   : > { %v604_v7 = vpack.c.bf16 %v271_v6, %v270_v4  ;;  %v267_v8 = vld [vmem:[%s228_s11] sm:$0xff]  ;;  %s381_s12 = sshll.u32 %s252_s25, 4  ;;  %s1110_s30 = scalar_lea.hbm %s1238_s2, %s1103_s23  ;;  %s1112_s12 = int_to_ptr.vmem [resolvable:$true] %s381_s12 }
  0x5d   : > { %602 = vmatpush3.bf16.msra.mxu0 %v601_v5  ;;  %s909_s27 = smov 96   ;;  %s357_s18 = scalar_lea.sflag [#allocation4], %s1086_s28 }
  0x5e   : > { %603 = vmatprep.subr.bf16.mxu0 %v906_v0  ;;  %s754_s13 = scalar_lea.vmem %s1112_s12, 128  ;;  %s910_s7 = smov [#allocation7]  }
  0x5f   : > { %p755_p6 = scmp.ne.s32.totalorder %s1112_s12, %s754_s13  ;;  %s758_s9 = sshll.u32 %s910_s7, 4  ;;  %s759_s9 = int_to_ptr.vmem [resolvable:$false] %s758_s9 }
  0x60   : > { %s760_s5 = scalar_lea.vmem %s759_s9, 256  ;;  %p761_p11 = scmp.lt.s32.totalorder %s1112_s12, %s759_s9 }
  0x61   : > { %605 = vmatpush3.bf16.msra.mxu0 %v604_v7  ;;  %p756_p8 = pnand %p755_p6, %p1033_p10  ;;  %p762_p0 = scmp.lt.s32.totalorder %s760_s5, %s754_s13 }
  0x63   : > { %p757_p12 = pneg %p756_p8  ;;  %p763_p5 = por %p762_p0, %p761_p11 }
  0x64   : > { %598 = vmatmul.mubr.msk.f32.vlgmr.msra.gmra.mrb[0].mxu0 %vm272_vm1, %v267_v8 }
  0x65   : > { %p764_p9 = pnand %p763_p5, %p757_p12 }
 0x137   : > { %v342_v9 = vpop.f32.mrb[0].mxu0 }
 0x138   : > { %346 = vst.msk [vmem:[%s252_s25] sm:$0xff] %vm272_vm1, %v342_v9  ;;  %348 = vrot.lane.b32.xlu0 %v342_v9, %s909_s27  ;;  %v599_v10 = vpop.f32.mrb[1].mxu0 }
 0x139   : > { %767 = shalt.err (!%p764_p9)
}
 0x13a   : > { %s768_s28 = scalar_lea.hbm %s1110_s30, 128  ;;  %s772_s14 = scalar_lea.hbm %s1238_s2, 256 }
 0x13b   : > { %p769_p1 = scmp.ne.s32.totalorder %s1110_s30, %s768_s28  ;;  %p773_p3 = scmp.lt.u32.totalorder %s1110_s30, %s1238_s2 }
 0x13c   : > { %p774_p13 = scmp.lt.u32.totalorder %s772_s14, %s768_s28  ;;  %p776_p6 = scmp.lt.u32.totalorder %s768_s28, %s1110_s30 }
 0x13d   : > { %p770_p2 = pnand %p769_p1, %p1033_p10 }
 0x13e   : > { %p775_p4 = por %p774_p13, %p773_p3 }
 0x13f   : > { %p771_p7 = pneg %p770_p2 }
 0x140   : > { %p777_p8 = por %p776_p6, %p775_p4 }
 0x142   : > { %p778_p12 = pnand %p777_p8, %p771_p7 }
 0x144   : > { %781 = shalt.err (!%p778_p12)
}
 0x145   : > { %612 = dma.vmem_to_hbm [thread:$0]  (%p1033_p10), %s1112_s12, 128, %s1110_s30, %s357_s18  }
 0x146   : > { %s911_s13 = smov 64   ;;  %s361_s7 = sand.u32 1, %s970_s21  }
 0x147   : > { %352 = vrot.lane.b32.xlu0 %v342_v9, %s911_s13  ;;  %s259_s9 = scalar_lea.vmem [#allocation8], %s1089_s10  ;;  %s1143_s25 = scalar_lea.hbm %s1239_s3, %s1103_s23 }
 0x148   : > { %s395_s5 = sshll.u32 %s259_s9, 4  ;;  %s266_s14 = scalar_lea.vmem [#allocation10], %s1089_s10  ;;  %s1145_s5 = int_to_ptr.vmem [resolvable:$true] %s395_s5 }
 0x149   : > { %s1150_s26 = sshll.u32 %s266_s14, 4  ;;  %s1153_s21 = scalar_lea.sflag [#allocation9], %s361_s7  ;;  %s1184_s26 = int_to_ptr.vmem [resolvable:$true] %s1150_s26 }
 0x14a   : > { %s782_s12 = scalar_lea.vmem %s1145_s5, 128  ;;  %s912_s30 = smov [#allocation8]  }
 0x14b   : > { %p783_p11 = scmp.ne.s32.totalorder %s1145_s5, %s782_s12  ;;  %s786_s18 = sshll.u32 %s912_s30, 4  ;;  %s787_s18 = int_to_ptr.vmem [resolvable:$false] %s786_s18 }
 0x14c   : > { %s788_s27 = scalar_lea.vmem %s787_s18, 256  ;;  %p789_p9 = scmp.lt.s32.totalorder %s1145_s5, %s787_s18 }
 0x14d   : > { %p784_p0 = pnand %p783_p11, %p1033_p10  ;;  %p790_p1 = scmp.lt.s32.totalorder %s788_s27, %s782_s12 }
 0x14f   : > { %p785_p5 = pneg %p784_p0  ;;  %p791_p2 = por %p790_p1, %p789_p9 }
 0x151   : > { %p792_p7 = pnand %p791_p2, %p785_p5 }
 0x1aa   : > { %v349_v11 = vpop.permute.xlu0 %348 }
 0x1ab   : > { %351 = vst.msk [vmem:[%s259_s9] sm:$0xff] %vm272_vm1, %v349_v11 }
 0x1ac   : > { %795 = shalt.err (!%p792_p7)
}
 0x1ad   : > { %s796_s13 = scalar_lea.hbm %s1143_s25, 128  ;;  %s800_s28 = scalar_lea.hbm %s1239_s3, 256 }
 0x1ae   : > { %p797_p3 = scmp.ne.s32.totalorder %s1143_s25, %s796_s13  ;;  %p801_p6 = scmp.lt.u32.totalorder %s1143_s25, %s1239_s3 }
 0x1af   : > { %p802_p8 = scmp.lt.u32.totalorder %s800_s28, %s796_s13  ;;  %p804_p11 = scmp.lt.u32.totalorder %s796_s13, %s1143_s25 }
 0x1b0   : > { %p798_p13 = pnand %p797_p3, %p1033_p10 }
 0x1b1   : > { %p803_p12 = por %p802_p8, %p801_p6 }
 0x1b2   : > { %p799_p4 = pneg %p798_p13 }
 0x1b3   : > { %p805_p0 = por %p804_p11, %p803_p12 }
 0x1b5   : > { %p806_p5 = pnand %p805_p0, %p799_p4 }
 0x1b7   : > { %809 = shalt.err (!%p806_p5)
}
 0x1b8   : > { %613 = dma.vmem_to_hbm [thread:$0]  (%p1033_p10), %s1145_s5, 128, %s1143_s25, %s1153_s21  }
 0x1b9   : > { %s1181_s27 = scalar_lea.hbm %s1240_s4, %s1103_s23  ;;  %v353_v12 = vpop.permute.xlu0 %352  ;;  %s810_s13 = scalar_lea.vmem %s1184_s26, 128 }
 0x1ba   : > { %355 = vst.msk [vmem:[%s266_s14] sm:$0xff] %vm272_vm1, %v353_v12  ;;  %p811_p9 = scmp.ne.s32.totalorder %s1184_s26, %s810_s13  ;;  %s913_s5 = smov [#allocation10]  }
 0x1bb   : > { %s814_s25 = sshll.u32 %s913_s5, 4  ;;  %s815_s25 = int_to_ptr.vmem [resolvable:$false] %s814_s25 }
 0x1bc   : > { %p812_p1 = pnand %p811_p9, %p1033_p10  ;;  %s816_s7 = scalar_lea.vmem %s815_s25, 256 }
 0x1bd   : > { %p817_p7 = scmp.lt.s32.totalorder %s1184_s26, %s815_s25  ;;  %p818_p3 = scmp.lt.s32.totalorder %s816_s7, %s810_s13 }
 0x1be   : > { %p813_p2 = pneg %p812_p1 }
 0x1bf   : > { %p819_p13 = por %p818_p3, %p817_p7 }
 0x1c1   : > { %p820_p4 = pnand %p819_p13, %p813_p2 }
 0x1c3   : > { %823 = shalt.err (!%p820_p4)
}
 0x1c4   : > { %s824_s10 = scalar_lea.hbm %s1181_s27, 128  ;;  %s828_s9 = scalar_lea.hbm %s1240_s4, 256 }
 0x1c5   : > { %p825_p6 = scmp.ne.s32.totalorder %s1181_s27, %s824_s10  ;;  %p829_p11 = scmp.lt.u32.totalorder %s1181_s27, %s1240_s4 }
 0x1c6   : > { %p830_p0 = scmp.lt.u32.totalorder %s828_s9, %s824_s10  ;;  %p832_p9 = scmp.lt.u32.totalorder %s824_s10, %s1181_s27 }
 0x1c7   : > { %p826_p8 = pnand %p825_p6, %p1033_p10 }
 0x1c8   : > { %p831_p5 = por %p830_p0, %p829_p11 }
 0x1c9   : > { %p827_p12 = pneg %p826_p8 }
 0x1ca   : > { %p833_p1 = por %p832_p9, %p831_p5 }
 0x1cc   : > { %p834_p2 = pnand %p833_p1, %p827_p12 }
 0x1ce   : > { %837 = shalt.err (!%p834_p2)
}
 0x1cf   : > { %614 = dma.vmem_to_hbm [thread:$0]  (%p1033_p10), %s1184_s26, 128, %s1181_s27, %s1153_s21  }
 0x1d0 PF: > { %s421_s30 = sand.u32 1, %s880_s15   ;;  %p1256_p7 = scmp.ne.s32.totalorder %s1245_s24, 0 }
 0x1d1   : > { %p1257_p3 = scmp.ge.s32.totalorder %s900_s20, 2  ;;  %s422_s12 = scalar_lea.sflag [#allocation4], %s421_s30 }
 0x1d3   : > { %p627_p13 = pnand %p1257_p3, %p1256_p7 }
 0x1d5   : > { %871 = dma.done.wait (!%p627_p13), %s422_s12, 128  }
 0x1d6   : > { %873 = vsyncadd (!%p627_p13), %s422_s12, 4294967168  ;;  %s430_s18 = sand.u32 1, %s563_s22  }
 0x1d7   : > { %s431_s13 = scalar_lea.sflag [#allocation9], %s430_s18 }
 0x1d8   : > { %875 = dma.done.wait (!%p627_p13), %s431_s13, 256  }
 0x1d9   : > { %877 = vsyncadd (!%p627_p13), %s431_s13, 4294967040  ;;  %s25_s20 = sadd.s32 1, %s900_s20   ;;  %s1258_s15 = smov %s884_s16 }
 0x1da   : > { %p22_p10 = scmp.ge.s32.totalorder %s25_s20, 4   ;;  %s1259_s16 = smov %s888_s17 }
 0x1db   : > { %s1260_s17 = smov %s1042_s8  ;;  %s1261_s18 = smov %s896_s19 }
 0x1dc   : > { %s1262_s19 = smov %s1264_s29  ;;  %24 = sbr.rel (!%p22_p10) target bundleno = 9 (0x9), region = 109 }
 0x1e3   :  { %445 = vsyncpa [#allocation3], 1 }
 0x1e4   :  { %447 = vsyncpa [#allocation3 + $0x1], 1 }
 0x1e5   :  { %448 = vsyncpa [#allocation6], 1 }
 0x1e6   :  { %449 = vsyncpa [#allocation4], 1 }
 0x1e7   :  { %451 = vsyncpa [#allocation4 + $0x1], 1 }
 0x1e8   :  { %452 = vsyncpa [#allocation9], 1 }
 0x1e9   :  { %454 = vsyncpa [#allocation9 + $0x1], 1 }

</bundles_post_ra>
